<compile_context>
chip_gen: v7x
topology: tpu7x:2x2x1
jax: 0.10.0
libtpu: 0.0.40
codegen_flags: <defaults>
</compile_context>

<pallas_src>
import math

import jax
import jax.numpy as jnp
from jax.experimental import pallas as pl
from jax.experimental.pallas import tpu as pltpu


# ----- Config (mirrors the PyTorch Config object) -----
class Config:
    EMBEDDING_DIM = 32
    HIDDEN_DIM = 64


_MAX_TILE_V = 4096            # vocab rows per stage-1 step (multiple of 128)
_MAX_TILE_N = 2048            # tokens per stage-2 step (multiple of 128)
_ONEHOT_BUDGET_BYTES = 2 * 1024 * 1024   # cap on the (R, TILE_N) one-hot


def _cdiv(a: int, b: int) -> int:
    return (a + b - 1) // b


def _round_up(x: int, m: int) -> int:
    return _cdiv(x, m) * m


def _choose_tiling(size: int, max_tile: int, align: int = 128):
    """Return (tile, padded) with tile % align == 0 and padded % tile == 0.

    Uses tiles up to max_tile and forces >= 2 grid steps whenever the size
    allows, so ("parallel",) grids can use both v7x TensorCores.
    """
    size = max(int(size), 1)
    steps = _cdiv(size, max_tile)
    if steps < 2 and size > align:
        steps = 2
    tile = _round_up(_cdiv(size, steps), align)
    return tile, steps * tile


def _score_table_kernel(emb_ref, w1_ref, b1_ref, w2_ref, b2_ref, s_ref):
    """Per-vocab scores, vocab on the lane axis.

    emb_ref : (TILE_V, E) bf16/f32  embedding rows, natural (V, E) layout
    w1_ref  : (H, E)      bf16/f32  fc1 weight (PyTorch out x in), resident
    b1_ref  : (H, 1)      f32       fc1 bias column
    w2_ref  : (H, 1)      f32       fc2 weight column
    b2_ref  : (1, 1)      f32       fc2 bias
    s_ref   : (1, TILE_V) f32       lane-dense scores
    """
    # fc1 on the MXU: contract E with a transposed RHS (q @ k^T pattern), so
    # no wrapper-side transpose pass over the embedding table is needed.
    h = jax.lax.dot_general(
        w1_ref[...], emb_ref[...],
        dimension_numbers=(((1,), (1,)), ((), ())),
        preferred_element_type=jnp.float32)                    # (H, TILE_V)
    h = jnp.maximum(h + b1_ref[...], 0.0)
    # fc2 on the VPU/XLU: broadcast multiply + sublane reduce (a width-1
    # matmul would waste the MXU; stage 1 is memory-bound anyway).
    z = jnp.sum(h * w2_ref[...], axis=0, keepdims=True) + b2_ref[...]
    s_ref[...] = jax.nn.sigmoid(z)                             # (1, TILE_V)


def _gather_scores_kernel(idx_ref, tab_ref, out_ref):
    """Two-level gather of precomputed scores, tokens on the lane axis.

    idx_ref : (1, TILE_N) int32  token ids (already clamped to [0, V-1])
    tab_ref : (128, R)    f32    score table, score(v) at [v % 128, v // 128];
                                 resident across the token grid
    out_ref : (1, TILE_N) f32    lane-dense gathered scores
    """
    idx = idx_ref[...]                                         # (1, T)
    r = tab_ref.shape[1]
    t = idx.shape[1]
    hi = idx >> 7                    # v // 128 -> row group (table lane index)
    lo = idx & 127                   # v %  128 -> sublane within the group

    if r == 1:
        # V <= 128: a single row group, no select needed.
        sel = jnp.broadcast_to(tab_ref[...], (128, t))
    else:
        # Row-group select on the MXU: (128, R) @ (R, TILE_N) one-hot.
        grp = jax.lax.broadcasted_iota(jnp.int32, (r, t), 0)   # (R, T)
        onehot = (grp == hi).astype(jnp.float32)               # (R, T)
        sel = jnp.dot(tab_ref[...], onehot,
                      preferred_element_type=jnp.float32)      # (128, T)
    # In-register sublane select + reduce -> lane-dense (1, T).
    sub = jax.lax.broadcasted_iota(jnp.int32, (128, t), 0)
    out_ref[...] = jnp.sum(jnp.where(sub == lo, sel, 0.0),
                           axis=0, keepdims=True)


def content_recommendation_forward(x_idx, emb_table, w1, b1, w2, b2, *,
                                   table_dtype=jnp.bfloat16):
    """x_idx: integer ids, any shape -> float32 of shape x_idx.shape + (1,).

    emb_table : (V, E)   nn.Embedding weight
    w1        : (H, E)   fc1 weight (PyTorch Linear layout: out x in)
    b1        : (H,)     fc1 bias
    w2        : (1, H)   fc2 weight
    b2        : (1,)     fc2 bias
    table_dtype: dtype of emb/W1 fed to the MXU.  bf16 (default) halves the
      HBM-bound table DMA; accumulation and the epilogue stay f32.  For
      repeated calls pass emb_table already in bf16 (or jit the caller) so the
      cast/pad passes are not redone per call.
    """
    emb_table = jnp.asarray(emb_table)
    V, E = map(int, emb_table.shape)
    H = int(w1.shape[0])
    orig_shape = x_idx.shape
    n = int(math.prod(orig_shape))

    # TODO(synk): when n << V, skip the full score table and DMA-gather only
    # the needed embedding rows (PrefetchScalarGridSpec + pl.Element gather).

    # ---------- Stage 1: per-vocab score table (grid over vocab tiles) -----
    tile_v, v_pad = _choose_tiling(V, _MAX_TILE_V)
    emb = emb_table if emb_table.dtype == table_dtype else emb_table.astype(table_dtype)
    if v_pad != V:
        emb = jnp.pad(emb, ((0, v_pad - V), (0, 0)))           # natural (V, E) layout
    w1_m = jnp.asarray(w1, table_dtype)                        # (H, E)
    b1_c = jnp.asarray(b1, jnp.float32).reshape(H, 1)          # (H, 1)
    w2_c = jnp.asarray(w2, jnp.float32).reshape(H, 1)          # (H, 1)
    b2_s = jnp.asarray(b2, jnp.float32).reshape(1, 1)          # (1, 1)

    itemsize = jnp.dtype(table_dtype).itemsize
    stage1_cost = pl.CostEstimate(
        flops=2 * v_pad * E * H + 4 * v_pad * H,
        transcendentals=v_pad,
        bytes_accessed=itemsize * (v_pad * E + H * E) + 4 * (2 * H + 1 + v_pad))

    scores_row = pl.pallas_call(
        _score_table_kernel,
        out_shape=jax.ShapeDtypeStruct((1, v_pad), jnp.float32),
        grid=(v_pad // tile_v,),
        in_specs=[
            pl.BlockSpec((tile_v, E), lambda j: (j, 0)),       # emb tile (natural layout)
            pl.BlockSpec((H, E), lambda j: (0, 0)),            # w1 (resident)
            pl.BlockSpec((H, 1), lambda j: (0, 0)),            # b1 (resident)
            pl.BlockSpec((H, 1), lambda j: (0, 0)),            # w2 (resident)
            pl.BlockSpec((1, 1), lambda j: (0, 0)),            # b2 (resident)
        ],
        out_specs=pl.BlockSpec((1, tile_v), lambda j: (0, j)),  # lane-dense scores
        compiler_params=pltpu.CompilerParams(dimension_semantics=("parallel",)),
        cost_estimate=stage1_cost,
    )(emb, w1_m, b1_c, w2_c, b2_s)

    # Lane-dense (128, R) score-table layout: score(v) at [v % 128, v // 128].
    # 4 B/score (no (V, 1) sublane blow-up); the reshape/transpose here touches
    # only v_pad*4 bytes -- negligible next to the table read above.
    num_groups = v_pad // 128
    scores_tab = scores_row.reshape(num_groups, 128).T          # (128, R)

    # ---------- Stage 2: gather scores per token (grid over token tiles) ---
    max_tile_n = min(
        _MAX_TILE_N,
        max(128, (_ONEHOT_BUDGET_BYTES // (4 * num_groups)) // 128 * 128))
    # TODO(synk): for very large V (where the (R, TILE_N) one-hot exceeds a few
    # MiB even at TILE_N=128), also tile the row-group axis of the gather.
    tile_n, n_pad = _choose_tiling(n, max_tile_n)

    # Clamp ids: PyTorch nn.Embedding raises on OOB; clamping also guarantees
    # padded vocab rows (which carry a nonzero bias-only score) are never read.
    idx = jnp.clip(jnp.asarray(x_idx).reshape(-1), 0, V - 1).astype(jnp.int32)
    if n_pad != n:
        idx = jnp.pad(idx, (0, n_pad - n))
    idx = idx.reshape(1, n_pad)

    stage2_cost = pl.CostEstimate(
        flops=2 * v_pad * n_pad + 6 * 128 * n_pad,
        transcendentals=0,
        bytes_accessed=4 * (v_pad + 2 * n_pad))

    out_row = pl.pallas_call(
        _gather_scores_kernel,
        out_shape=jax.ShapeDtypeStruct((1, n_pad), jnp.float32),
        grid=(n_pad // tile_n,),
        in_specs=[
            pl.BlockSpec((1, tile_n), lambda i: (0, i)),        # token ids (lanes)
            pl.BlockSpec((128, num_groups), lambda i: (0, 0)),  # score table (resident)
        ],
        out_specs=pl.BlockSpec((1, tile_n), lambda i: (0, i)),  # lane-dense output
        compiler_params=pltpu.CompilerParams(dimension_semantics=("parallel",)),
        cost_estimate=stage2_cost,
    )(idx, scores_tab)

    return out_row[0, :n].reshape(orig_shape + (1,))


def _reference_forward(x_idx, emb_table, w1, b1, w2, b2):
    """Pure-JAX reference with identical semantics to the PyTorch forward."""
    e = emb_table[x_idx]                               # (..., E)
    h = jnp.maximum(e @ w1.T + b1, 0.0)                # (..., H)
    return jax.nn.sigmoid(h @ w2.T + b2)               # (..., 1)


if __name__ == "__main__":
    key = jax.random.PRNGKey(0)
    k_idx, k_emb, k_w1, k_b1, k_w2, k_b2, k_idx2 = jax.random.split(key, 7)

    def make_params(vocab):
        emb = jax.random.normal(k_emb, (vocab, Config.EMBEDDING_DIM), jnp.float32) * 0.1
        w1 = jax.random.normal(k_w1, (Config.HIDDEN_DIM, Config.EMBEDDING_DIM), jnp.float32) * 0.1
        b1 = jax.random.normal(k_b1, (Config.HIDDEN_DIM,), jnp.float32) * 0.1
        w2 = jax.random.normal(k_w2, (1, Config.HIDDEN_DIM), jnp.float32) * 0.1
        b2 = jax.random.normal(k_b2, (1,), jnp.float32) * 0.1
        return emb, w1, b1, w2, b2

    def check(x, params):
        emb, w1, b1, w2, b2 = params
        out = jax.block_until_ready(
            content_recommendation_forward(x, emb, w1, b1, w2, b2))
        assert out.shape == x.shape + (1,), out.shape
        # Tight check vs a reference using the same bf16-quantized emb / W1.
        emb_q = emb.astype(jnp.bfloat16).astype(jnp.float32)
        w1_q = w1.astype(jnp.bfloat16).astype(jnp.float32)
        ref_q = _reference_forward(x, emb_q, w1_q, b1, w2, b2)
        assert jnp.allclose(out, ref_q, atol=1e-3, rtol=1e-3), \
            float(jnp.max(jnp.abs(out - ref_q)))
        # Loose check vs the pure-f32 PyTorch-semantics reference.
        ref = _reference_forward(x, emb, w1, b1, w2, b2)
        assert jnp.allclose(out, ref, atol=2e-2, rtol=2e-2), \
            float(jnp.max(jnp.abs(out - ref)))

    # Case 1: spec-scale demo (V=128, batch=2, seq=8) -- single-tile grids,
    # R == 1 broadcast path in the gather.
    vocab1 = 128
    x1 = jax.random.randint(k_idx, (2, 8), 0, vocab1, jnp.int32)
    check(x1, make_params(vocab1))

    # Case 2: multi-step grids, padding, and the MXU row-group select (R > 1).
    vocab2 = 1536
    x2 = jax.random.randint(k_idx2, (3, 100), 0, vocab2, jnp.int32)
    check(x2, make_params(vocab2))

    print("KERNEL_OK")
</pallas_src>

<mosaic_0001>
module attributes {stable_mosaic.version = 11 : i64} {
  func.func @_score_table_kernel(%arg0: i32, %arg1: memref<128x32xbf16, #tpu.memory_space<vmem>>, %arg2: memref<64x32xbf16, #tpu.memory_space<vmem>>, %arg3: memref<64x1xf32, #tpu.memory_space<vmem>>, %arg4: memref<64x1xf32, #tpu.memory_space<vmem>>, %arg5: memref<1x1xf32, #tpu.memory_space<vmem>>, %arg6: memref<1x128xf32, #tpu.memory_space<vmem>>) attributes {dimension_semantics = [#tpu.dimension_semantics<parallel>], iteration_bounds = array<i64: 1>, scalar_prefetch = 0 : i64, scratch_operands = 0 : i64, tpu.core_type = #tpu.core_type<tc>, window_params = [{transform_indices = @transform_0, window_bounds = array<i64: 128, 32>}, {pipeline_mode = #tpu.pipeline_mode<synchronous>, transform_indices = @transform_1, window_bounds = array<i64: 64, 32>}, {pipeline_mode = #tpu.pipeline_mode<synchronous>, transform_indices = @transform_2, window_bounds = array<i64: 64, 1>}, {pipeline_mode = #tpu.pipeline_mode<synchronous>, transform_indices = @transform_3, window_bounds = array<i64: 64, 1>}, {pipeline_mode = #tpu.pipeline_mode<synchronous>, transform_indices = @transform_4, window_bounds = array<i64: 1, 1>}, {transform_indices = @transform_5, window_bounds = array<i64: 1, 128>}]} {
    %c0 = arith.constant 0 : index
    %c0_0 = arith.constant 0 : index
    %0 = vector.load %arg2[%c0, %c0_0] : memref<64x32xbf16, #tpu.memory_space<vmem>>, vector<64x32xbf16>
    %c0_1 = arith.constant 0 : index
    %c0_2 = arith.constant 0 : index
    %1 = vector.load %arg1[%c0_1, %c0_2] : memref<128x32xbf16, #tpu.memory_space<vmem>>, vector<128x32xbf16>
    %cst = arith.constant dense<0.000000e+00> : vector<64x128xf32>
    %2 = tpu.matmul %0, %1, %cst {dimension_numbers = #tpu.dot_dimension_numbers<[1], [1], [0], [0], [0, 0, 1, 0], [], []>} : vector<64x32xbf16>, vector<128x32xbf16>, vector<64x128xf32> -> vector<64x128xf32>
    %c0_3 = arith.constant 0 : index
    %c0_4 = arith.constant 0 : index
    %3 = vector.load %arg3[%c0_3, %c0_4] : memref<64x1xf32, #tpu.memory_space<vmem>>, vector<64x1xf32>
    %4 = vector.broadcast %3 : vector<64x1xf32> to vector<64x128xf32>
    %5 = arith.addf %2, %4 : vector<64x128xf32>
    %cst_5 = arith.constant 0.000000e+00 : f32
    %6 = vector.broadcast %cst_5 : f32 to vector<64x128xf32>
    %7 = arith.maximumf %5, %6 : vector<64x128xf32>
    %c0_6 = arith.constant 0 : index
    %c0_7 = arith.constant 0 : index
    %8 = vector.load %arg4[%c0_6, %c0_7] : memref<64x1xf32, #tpu.memory_space<vmem>>, vector<64x1xf32>
    %9 = vector.broadcast %8 : vector<64x1xf32> to vector<64x128xf32>
    %10 = arith.mulf %7, %9 : vector<64x128xf32>
    %cst_8 = arith.constant dense<0.000000e+00> : vector<128xf32>
    %11 = vector.multi_reduction <add>, %10, %cst_8 [0] : vector<64x128xf32> to vector<128xf32>
    %12 = vector.shape_cast %11 : vector<128xf32> to vector<1x128xf32>
    %c0_9 = arith.constant 0 : index
    %c0_10 = arith.constant 0 : index
    %13 = vector.load %arg5[%c0_9, %c0_10] : memref<1x1xf32, #tpu.memory_space<vmem>>, vector<1x1xf32>
    %14 = vector.broadcast %13 : vector<1x1xf32> to vector<1x128xf32>
    %15 = arith.addf %12, %14 : vector<1x128xf32>
    %16 = arith.negf %15 : vector<1x128xf32>
    %17 = math.exp %16 : vector<1x128xf32>
    %cst_11 = arith.constant 1.000000e+00 : f32
    %18 = vector.broadcast %cst_11 : f32 to vector<1x128xf32>
    %19 = arith.addf %18, %17 : vector<1x128xf32>
    %20 = arith.divf %18, %19 : vector<1x128xf32>
    %c0_12 = arith.constant 0 : index
    %c0_13 = arith.constant 0 : index
    %21 = vector.load %arg6[%c0_12, %c0_13] : memref<1x128xf32, #tpu.memory_space<vmem>>, vector<1x128xf32>
    tpu.vector_store %arg6[%c0_12, %c0_13], %20 {strides = array<i32>} : memref<1x128xf32, #tpu.memory_space<vmem>>, vector<1x128xf32>,
    return
  }
  func.func @transform_0(%arg0: i32) -> (i32, i32) {
    %c0_i32 = arith.constant 0 : i32
    %c0_i32_0 = arith.constant 0 : i32
    return %arg0, %c0_i32 : i32, i32
  }
  func.func @transform_1(%arg0: i32) -> (i32, i32) {
    %c0_i32 = arith.constant 0 : i32
    %c0_i32_0 = arith.constant 0 : i32
    %c0_i32_1 = arith.constant 0 : i32
    return %c0_i32, %c0_i32_0 : i32, i32
  }
  func.func @transform_2(%arg0: i32) -> (i32, i32) {
    %c0_i32 = arith.constant 0 : i32
    %c0_i32_0 = arith.constant 0 : i32
    %c0_i32_1 = arith.constant 0 : i32
    return %c0_i32, %c0_i32_0 : i32, i32
  }
  func.func @transform_3(%arg0: i32) -> (i32, i32) {
    %c0_i32 = arith.constant 0 : i32
    %c0_i32_0 = arith.constant 0 : i32
    %c0_i32_1 = arith.constant 0 : i32
    return %c0_i32, %c0_i32_0 : i32, i32
  }
  func.func @transform_4(%arg0: i32) -> (i32, i32) {
    %c0_i32 = arith.constant 0 : i32
    %c0_i32_0 = arith.constant 0 : i32
    %c0_i32_1 = arith.constant 0 : i32
    return %c0_i32, %c0_i32_0 : i32, i32
  }
  func.func @transform_5(%arg0: i32) -> (i32, i32) {
    %c0_i32 = arith.constant 0 : i32
    %c0_i32_0 = arith.constant 0 : i32
    return %c0_i32, %arg0 : i32, i32
  }
}

</mosaic_0001>

<bundles_post_ra>
// kernel: tpu_custom_call.1
= control target key start
LH: loop header
LB: loop body
LE: loop exit
PB: predicated region body
PF: predicated region fallthrough
CT: control target
= control target key end

     0   :  { %s655_s0 = inlined_call_operand.vmem [shape: bf16[128,32], index: 0, kind: input, shape index: {}]   ;;  %s656_s1 = inlined_call_operand.vmem [shape: bf16[64,32], index: 1, kind: input, shape index: {}]   ;;  %s657_s2 = inlined_call_operand.vmem [shape: f32[64,1], index: 2, kind: input, shape index: {}]   ;;  %s658_s3 = inlined_call_operand.vmem [shape: f32[64,1], index: 3, kind: input, shape index: {}]   ;;  %s659_s4 = inlined_call_operand.<no memory space> [shape: f32[1,1], index: 4, kind: input, shape index: {}]   ;;  %s660_s5 = inlined_call_operand.hbm [shape: f32[1,128], index: 5, kind: output, shape index: {}]  }
   0x1   :  { %v10_v0 = vstv %s659_s4 }
   0x2   :  { %11 = vst [vmem:[#allocation2] sm:$0x1] %v10_v0 }
   0x3   :  { %v456_v1 = vld [vmem:[%s655_s0] sm:$0xff]   ;;  %vm156_vm0 = vcmask 261120   ;;  %v457_v2 = vld [vmem:[%s655_s0 + $0x8] sm:$0xff]   ;;  %v496_v4 = vmov 0   ;;  %v458_v5 = vld [vmem:[%s655_s0 + $0x10] sm:$0xff]  }
   0x4   :  { %436 = vmatprep.subr.msk.bf16.mxu0 %vm156_vm0, %v456_v1  ;;  %437 = vmatprep.subr.msk.bf16.mxu1 %vm156_vm0, %v456_v1  ;;  %v170_v3 = vsel %vm156_vm0, %v456_v1, 0  ;;  %v173_v6 = vsel %vm156_vm0, %v457_v2, 0  ;;  %v464_v7 = vld [vmem:[%s656_s1] sm:$0xff]   ;;  %v465_v8 = vld [vmem:[%s656_s1 + $0x10] sm:$0xff]   ;;  %v49_v11 = vld [vmem:[%s657_s2 + $0x8] sm:$0xff]  ;;  %v176_v13 = vsel %vm156_vm0, %v458_v5, 0 }
   0x5   :  { %397 = vmatpush3.bf16.xpose.msra.mxu0 %v170_v3  ;;  %428 = vmatpush3.bf16.xpose.msra.mxu1 %v170_v3  ;;  %v48_v9 = vld [vmem:[%s657_s2] sm:$0xff]  ;;  %v50_v10 = vld [vmem:[%s657_s2 + $0x10] sm:$0xff]  ;;  %v51_v12 = vld [vmem:[%s657_s2 + $0x18] sm:$0xff] }
   0x6   :  { %438 = vmatprep.subr.msk.bf16.mxu0 %vm156_vm0, %v457_v2  ;;  %439 = vmatprep.subr.msk.bf16.mxu1 %vm156_vm0, %v457_v2  ;;  %v459_v14 = vld [vmem:[%s655_s0 + $0x18] sm:$0xff]  }
   0x7   :  { %454 = vset.pattern.permute.xlu0 %v496_v4  ;;  %455 = vset.pattern.permute.xlu1 %v496_v4 }
   0x8   :  { %412 = vmatprep.mubr.msk.bf16.mxu0 %vm156_vm0, %v464_v7  ;;  %416 = vmatprep.mubr.msk.bf16.mxu1 %vm156_vm0, %v465_v8 }
   0x9   :  { %58 = vperm.xlu0 %454, %v48_v9   ;;  %68 = vperm.xlu1 %455, %v50_v10  }
   0xd   :  { %399 = vmatpush3.bf16.xpose.msra.mxu0 %v173_v6  ;;  %429 = vmatpush3.bf16.xpose.msra.mxu1 %v173_v6 }
   0xe   :  { %440 = vmatprep.subr.msk.bf16.mxu0 %vm156_vm0, %v458_v5  ;;  %441 = vmatprep.subr.msk.bf16.mxu1 %vm156_vm0, %v458_v5 }
   0xf   :  { %63 = vperm.xlu0 %454, %v49_v11  }
  0x10   :  { %12 = vsyncpa [#allocation4], 0  ;;  %v266_v15 = vld [vmem:[%s658_s3] sm:$0xff]  ;;  %73 = vperm.xlu1 %455, %v51_v12   ;;  %v267_v16 = vld [vmem:[%s658_s3 + $0x8] sm:$0xff]  ;;  %v179_v19 = vsel %vm156_vm0, %v459_v14, 0 }
  0x11   :  { %v52_v17 = vld [vmem:[%s657_s2 + $0x20] sm:$0xff]  ;;  %v268_v18 = vld [vmem:[%s658_s3 + $0x10] sm:$0xff]  ;;  %v53_v21 = vld [vmem:[%s657_s2 + $0x28] sm:$0xff] }
  0x12   :  { %v460_v20 = vld [vmem:[%s655_s0 + $0x20] sm:$0xff]   ;;  %v269_v22 = vld [vmem:[%s658_s3 + $0x18] sm:$0xff]  ;;  %v54_v23 = vld [vmem:[%s657_s2 + $0x30] sm:$0xff] }
  0x13   :  { %276 = vperm.xlu0 %454, %v266_v15   ;;  %v270_v24 = vld [vmem:[%s658_s3 + $0x20] sm:$0xff]  ;;  %v182_v25 = vsel %vm156_vm0, %v460_v20, 0  ;;  %v461_v26 = vld [vmem:[%s655_s0 + $0x28] sm:$0xff]   ;;  %v55_v27 = vld [vmem:[%s657_s2 + $0x38] sm:$0xff] }
  0x14   :  { %281 = vperm.xlu1 %455, %v267_v16   ;;  %v271_v28 = vld [vmem:[%s658_s3 + $0x28] sm:$0xff]  ;;  %v272_v29 = vld [vmem:[%s658_s3 + $0x30] sm:$0xff]  ;;  %v273_v30 = vld [vmem:[%s658_s3 + $0x38] sm:$0xff]  ;;  %v185_v31 = vsel %vm156_vm0, %v461_v26, 0 }
  0x15   :  { %401 = vmatpush3.bf16.xpose.msra.mxu0 %v176_v13  ;;  %430 = vmatpush3.bf16.xpose.msra.mxu1 %v176_v13  ;;  %v462_v32 = vld [vmem:[%s655_s0 + $0x30] sm:$0xff]   ;;  %v335_v33 = vld [vmem:[#allocation2] sm:$0x1]  ;;  %v463_v35 = vld [vmem:[%s655_s0 + $0x38] sm:$0xff]   ;;  %s497_s0 = smov [#allocation3]  }
  0x16   :  { %442 = vmatprep.subr.msk.bf16.mxu0 %vm156_vm0, %v459_v14  ;;  %443 = vmatprep.subr.msk.bf16.mxu1 %vm156_vm0, %v459_v14  ;;  %v188_v34 = vsel %vm156_vm0, %v462_v32, 0  ;;  %v191_v36 = vsel %vm156_vm0, %v463_v35, 0  ;;  %v466_v37 = vld [vmem:[%s656_s1 + $0x8] sm:$0xff]   ;;  %v467_v38 = vld [vmem:[%s656_s1 + $0x18] sm:$0xff]   ;;  %s359_s1 = sshll.u32 %s497_s0, 4  ;;  %s360_s1 = int_to_ptr.vmem [resolvable:$true] %s359_s1 }
  0x17   :  { %78 = vperm.xlu0 %454, %v52_v17   ;;  %s472_s22 = scalar_lea.vmem %s360_s1, 16  ;;  %s476_s23 = scalar_lea.vmem %s360_s1, 32 }
  0x18   :  { %286 = vperm.xlu1 %455, %v268_v18   ;;  %p473_p0 = scmp.ne.s32.totalorder %s360_s1, %s472_s22  ;;  %p477_p1 = scmp.lt.s32.totalorder %s360_s1, %s360_s1 }
  0x19   :  { %p478_p2 = scmp.lt.s32.totalorder %s476_s23, %s472_s22 }
  0x1b   :  { %83 = vperm.xlu0 %454, %v53_v21   ;;  %p479_p3 = por %p478_p2, %p477_p1 }
  0x1c   :  { %291 = vperm.xlu1 %455, %v269_v22  }
  0x1d   :  { %403 = vmatpush3.bf16.xpose.msra.mxu0 %v179_v19  ;;  %431 = vmatpush3.bf16.xpose.msra.mxu1 %v179_v19  ;;  %p480_p4 = pnand %p479_p3, %p473_p0 }
  0x1e   :  { %444 = vmatprep.subr.msk.bf16.mxu0 %vm156_vm0, %v460_v20  ;;  %445 = vmatprep.subr.msk.bf16.mxu1 %vm156_vm0, %v460_v20 }
  0x1f   :  { %88 = vperm.xlu0 %454, %v54_v23  }
  0x20   :  { %296 = vperm.xlu1 %455, %v270_v24  }
  0x23   :  { %93 = vperm.xlu0 %454, %v55_v27  }
  0x24   :  { %301 = vperm.xlu1 %455, %v271_v28  }
  0x25   :  { %405 = vmatpush3.bf16.xpose.msra.mxu0 %v182_v25  ;;  %432 = vmatpush3.bf16.xpose.msra.mxu1 %v182_v25 }
  0x26   :  { %446 = vmatprep.subr.msk.bf16.mxu0 %vm156_vm0, %v461_v26  ;;  %447 = vmatprep.subr.msk.bf16.mxu1 %vm156_vm0, %v461_v26 }
  0x27   :  { %306 = vperm.xlu0 %454, %v272_v29   ;;  %v341_v29 = vlaneseq }
  0x28   :  { %311 = vperm.xlu1 %455, %v273_v30  }
  0x2b   :  { %338 = vperm.xlu0 %454, %v335_v33  }
  0x2d   :  { %407 = vmatpush3.bf16.xpose.msra.mxu0 %v185_v31  ;;  %433 = vmatpush3.bf16.xpose.msra.mxu1 %v185_v31 }
  0x2e   :  { %448 = vmatprep.subr.msk.bf16.mxu0 %vm156_vm0, %v462_v32  ;;  %449 = vmatprep.subr.msk.bf16.mxu1 %vm156_vm0, %v462_v32  ;;  %v342_v32 = vshrl.u32 %v341_v29, 7 }
  0x35   :  { %409 = vmatpush3.bf16.xpose.msra.mxu0 %v188_v34  ;;  %434 = vmatpush3.bf16.xpose.msra.mxu1 %v188_v34 }
  0x36   :  { %450 = vmatprep.subr.msk.bf16.mxu0 %vm156_vm0, %v463_v35  ;;  %451 = vmatprep.subr.msk.bf16.mxu1 %vm156_vm0, %v463_v35  ;;  %v343_v35 = vsub.s32 0, %v342_v32 }
  0x3d   :  { %411 = vmatpush3.bf16.xpose.msra.mxu0 %v191_v36  ;;  %435 = vmatpush3.bf16.xpose.msra.mxu1 %v191_v36 }
  0x44   :  { %413 = vmatmul.mubr.msk.bf16.vlgmr.msra.gmra.mrb[0].mxu0 %vm156_vm0, %v466_v37  ;;  %417 = vmatmul.mubr.msk.bf16.vlgmr.msra.gmra.mrb[0].mxu1 %vm156_vm0, %v467_v38 }
  0x88   :  { %v59_v39 = vpop.permute.xlu0 %58  ;;  %v69_v40 = vpop.permute.xlu1 %68 }
  0x8e   :  { %v64_v41 = vpop.permute.xlu0 %63 }
  0x8f   :  { %v74_v42 = vpop.permute.xlu1 %73 }
  0x92   :  { %v277_v43 = vpop.permute.xlu0 %276 }
  0x93   :  { %v282_v44 = vpop.permute.xlu1 %281 }
  0x96   :  { %v79_v45 = vpop.permute.xlu0 %78 }
  0x97   :  { %v287_v46 = vpop.permute.xlu1 %286 }
  0x9a   :  { %v84_v47 = vpop.permute.xlu0 %83 }
  0x9b   :  { %v292_v48 = vpop.permute.xlu1 %291 }
  0x9e   :  { %v89_v62 = vpop.permute.xlu0 %88 }
  0x9f   :  { %v297_v2 = vpop.permute.xlu1 %296 }
  0xa2   :  { %v94_v11 = vpop.permute.xlu0 %93 }
  0xa3   :  { %v302_v16 = vpop.permute.xlu1 %301 }
  0xa6   :  { %v307_v23 = vpop.permute.xlu0 %306 }
  0xa7   :  { %v312_v26 = vpop.permute.xlu1 %311 }
  0xaa   :  { %v339_v37 = vpop.permute.xlu0 %338 }
 0x117   :  { %v414_v49 = vpop.f32.mrb[0].mxu0  ;;  %v418_v50 = vpop.f32.mrb[0].mxu1 }
 0x118   :  { %v227_v51 = vpop.f32.mrb[1].mxu0  ;;  %v243_v52 = vpop.f32.mrb[1].mxu1  ;;  %v236_v53 = vadd.f32 %v414_v49, %v69_v40  ;;  %v252_v8 = vadd.f32 %v418_v50, %v89_v62 }
 0x119   :  { %v228_v54 = vadd.f32 %v227_v51, %v59_v39  ;;  %v415_v55 = vpop.f32.mrb[2].mxu0  ;;  %v419_v56 = vpop.f32.mrb[2].mxu1  ;;  %v244_v0 = vadd.f32 %v243_v52, %v79_v45  ;;  %v344_v39 = vrot.slane %v339_v37, %v343_v35 }
 0x11a   :  { %v230_v57 = vpop.f32.mrb[3].mxu0  ;;  %v246_v58 = vpop.f32.mrb[3].mxu1  ;;  %v239_v60 = vadd.f32 %v415_v55, %v74_v42  ;;  %v260_v63 = vmax.f32 %v236_v53, 0.0  ;;  %v255_v13 = vadd.f32 %v419_v56, %v94_v11  ;;  %v264_v17 = vmax.f32 %v252_v8, 0.0 }
 0x11b   :  { %v258_v59 = vmax.f32 %v228_v54, 0.0  ;;  %v231_v61 = vadd.f32 %v230_v57, %v64_v41  ;;  %v247_v6 = vadd.f32 %v246_v58, %v84_v47  ;;  %v262_v9 = vmax.f32 %v244_v0, 0.0 }
 0x11c   :  { %v261_v4 = vmax.f32 %v239_v60, 0.0  ;;  %v316_v7 = vmul.f32 %v287_v46, %v260_v63  ;;  %v265_v20 = vmax.f32 %v255_v13, 0.0  ;;  %v320_v24 = vmul.f32 %v307_v23, %v264_v17 }
 0x11d   :  { %v259_v1 = vmax.f32 %v231_v61, 0.0  ;;  %v314_v3 = vmul.f32 %v277_v43, %v258_v59  ;;  %v263_v15 = vmax.f32 %v247_v6, 0.0  ;;  %v318_v18 = vmul.f32 %v297_v2, %v262_v9 }
 0x11e   :  { %v317_v12 = vmul.f32 %v292_v48, %v261_v4  ;;  %v321_v27 = vmul.f32 %v312_v26, %v265_v20 }
 0x11f   :  { %v315_v5 = vmul.f32 %v282_v44, %v259_v1  ;;  %v319_v21 = vmul.f32 %v302_v16, %v263_v15 }
 0x121   :  { %v322_v10 = vadd.f32 %v315_v5, %v314_v3 }
 0x123   :  { %v323_v14 = vadd.f32 %v322_v10, %v316_v7 }
 0x125   :  { %v324_v19 = vadd.f32 %v323_v14, %v317_v12 }
 0x127   :  { %v325_v22 = vadd.f32 %v324_v19, %v318_v18 }
 0x129   :  { %v326_v25 = vadd.f32 %v325_v22, %v319_v21 }
 0x12b   :  { %v327_v28 = vadd.f32 %v326_v25, %v320_v24 }
 0x12d   :  { %v328_v30 = vadd.f32 %v327_v28, %v321_v27 }
 0x12f   :  { %v329_v31 = vrot.slane %v328_v30, 4 }
 0x131   :  { %v330_v33 = vadd.f32 %v329_v31, %v328_v30 }
 0x133   :  { %v331_v34 = vrot.slane %v330_v33, 2 }
 0x135   :  { %v332_v36 = vadd.f32 %v331_v34, %v330_v33 }
 0x137   :  { %v333_v38 = vrot.slane %v332_v36, 1 }
 0x139   :  { %v334_v40 = vadd.f32 %v333_v38, %v332_v36 }
 0x13b   :  { %v345_v41 = vadd.f32 %v344_v39, %v334_v40 }
 0x13d   :  { %v383_v42 = vmul.f32 -1.442695, %v345_v41 }
 0x13f   :  { %468 = vpow2.f32 %v383_v42 }
 0x149   :  { %v469_v43 = vpop.eup %468 }
 0x14a   :  { %v349_v44 = vadd.f32 1.0, %v469_v43 }
 0x14c   :  { %470 = vrcp.f32 %v349_v44 }
 0x156   :  { %v471_v45 = vpop.eup %470 }
 0x157   :  { %352 = vst [vmem:[#allocation3] sm:$0x1] %v471_v45 }
 0x158   :  { %483 = shalt.err (!%p480_p4)
}
 0x159   :  { %s484_s25 = scalar_lea.hbm %s660_s5, 16 }
 0x15a   :  { %p485_p5 = scmp.ne.s32.totalorder %s660_s5, %s484_s25  ;;  %p488_p6 = scmp.lt.u32.totalorder %s484_s25, %s660_s5 }
 0x15c   :  { %p490_p7 = pnand %p488_p6, %p485_p5 }
 0x15e   :  { %493 = shalt.err (!%p490_p7)
}
 0x15f   :  { %362 = dma.vmem_to_hbm [thread:$0]  %s360_s1, 16, %s660_s5, [#allocation4]  }
 0x160   :  { %494 = dma.done.wait [#allocation4], 16  }
 0x161   :  { %495 = vsyncadd [#allocation4], 4294967280 }
 0x162   :  { %366 = vsyncpa [#allocation4], 1 }

</bundles_post_ra>
